<compile_context>
chip_gen: v5e
topology: v5e:2x2
jax: 0.10.0
libtpu: 0.0.40
codegen_flags: <defaults>
</compile_context>

<pallas_src>
import jax
import jax.numpy as jnp
from jax.experimental import pallas as pl
from jax.experimental.pallas import tpu as pltpu


def _bernoulli_mn_kernel(theta_t_ref,
                         w_in_ref, b_in_ref,
                         w_h0_ref, b_h0_ref,
                         w_h1_ref, b_h1_ref,
                         w_out_ref, b_out_ref,
                         out_ref):
    """Whole MLP forward for one batch tile, entirely in VMEM.

    Transposed ("batch on lanes") layout:
      theta_t_ref : (n_input,  TB)   bf16
      w_in_ref    : (n_hidden, n_input)  bf16   b_in_ref  : (n_hidden, 1) f32
      w_h{k}_ref  : (n_hidden, n_hidden) bf16   b_h{k}_ref: (n_hidden, 1) f32
      w_out_ref   : (n_output, n_hidden) bf16   b_out_ref : (n_output, 1) f32
      out_ref     : (n_output, TB)   f32
    """
    x = theta_t_ref[...]                                        # (n_input, TB) bf16

    # bf16 x bf16 MXU matmuls, f32 accumulation; bias add + sigmoid in f32;
    # activations cast back to bf16 so every dot sees native bf16 operands.
    h = jnp.dot(w_in_ref[...], x, preferred_element_type=jnp.float32) + b_in_ref[...]
    h = jax.nn.sigmoid(h).astype(jnp.bfloat16)                  # (n_hidden, TB)

    h = jnp.dot(w_h0_ref[...], h, preferred_element_type=jnp.float32) + b_h0_ref[...]
    h = jax.nn.sigmoid(h).astype(jnp.bfloat16)

    h = jnp.dot(w_h1_ref[...], h, preferred_element_type=jnp.float32) + b_h1_ref[...]
    h = jax.nn.sigmoid(h).astype(jnp.bfloat16)

    # Final layer: (n_output, n_hidden) @ (n_hidden, TB) -> (n_output, TB).
    # TB is lane-dense, so the store is an unmasked full-lane vst.
    o = jnp.dot(w_out_ref[...], h, preferred_element_type=jnp.float32) + b_out_ref[...]
    out_ref[...] = jax.nn.sigmoid(o).astype(out_ref.dtype)


# Largest tiles first; per-step VMEM stays in the low-MiB range even at 8192.
_TILE_CANDIDATES = (8192, 4096, 2048, 1024, 512, 256, 128)


def _default_batch_tile(batch):
    """Pick a lane-aligned batch tile.

    Prefer the largest tile giving an EVEN (>=2) step count so v7x's two
    TensorCores get balanced work; otherwise the largest divisor tile (single or
    odd step count — fine on single-TC v5e/v6e); otherwise one full-batch step.
    """
    for t in _TILE_CANDIDATES:
        if batch % t == 0 and (batch // t) % 2 == 0:
            return t
    for t in _TILE_CANDIDATES:
        if batch % t == 0:
            return t
    return batch  # awkward batch size: single full-batch tile (last dim spans array)


def bernoulli_mn_forward(theta, params, *, batch_tile=None,
                         input_dtype=jnp.bfloat16, theta_is_transposed=False):
    """Pallas wrapper: p = BernoulliMN.forward(theta).

    theta:  (B, n_input) float32, or (n_input, B) in `input_dtype` if
            theta_is_transposed=True (skips the wrapper transpose HBM pass).
    params: dict with keys w_in, b_in, w_h0, b_h0, w_h1, b_h1, w_out, b_out
            (weights in (in, out) layout, biases as (1, out), as in init_params).
    Returns (B, n_output) float32 probabilities.
    """
    if theta_is_transposed:
        n_input, B = theta.shape
        theta_t = theta.astype(input_dtype)
    else:
        B, n_input = theta.shape
        theta_t = theta.astype(input_dtype).T      # cast first -> transpose reads bf16
    n_hidden = params["w_in"].shape[1]
    n_output = params["w_out"].shape[1]

    if batch_tile is None:
        batch_tile = _default_batch_tile(B)
    assert B % batch_tile == 0, "batch must be divisible by batch_tile"
    # Lane-axis (last-dim) blocks must be a multiple of 128 unless they span the array.
    assert batch_tile == B or batch_tile % 128 == 0, (
        "batch_tile must be a multiple of 128 (or equal to the full batch)")
    grid = (B // batch_tile,)

    # Transposed weights in bf16 (MXU operands); biases stay f32 for the VPU add.
    w_in_t = params["w_in"].T.astype(jnp.bfloat16)
    w_h0_t = params["w_h0"].T.astype(jnp.bfloat16)
    w_h1_t = params["w_h1"].T.astype(jnp.bfloat16)
    w_out_t = params["w_out"].T.astype(jnp.bfloat16)
    b_in_t = params["b_in"].T.astype(jnp.float32)               # (n_hidden, 1)
    b_h0_t = params["b_h0"].T.astype(jnp.float32)
    b_h1_t = params["b_h1"].T.astype(jnp.float32)
    b_out_t = params["b_out"].T.astype(jnp.float32)             # (n_output, 1)

    def _const(shape):
        # Weights/biases: full-array block, same block every grid step (fetched once).
        return pl.BlockSpec(shape, lambda i: (0, 0))

    in_specs = [
        pl.BlockSpec((n_input, batch_tile), lambda i: (0, i)),  # theta^T tiled over lanes
        _const((n_hidden, n_input)),  _const((n_hidden, 1)),    # input layer
        _const((n_hidden, n_hidden)), _const((n_hidden, 1)),    # hidden layer 0
        _const((n_hidden, n_hidden)), _const((n_hidden, 1)),    # hidden layer 1
        _const((n_output, n_hidden)), _const((n_output, 1)),    # output layer
    ]
    out_spec = pl.BlockSpec((n_output, batch_tile), lambda i: (0, i))

    itemsize = jnp.dtype(input_dtype).itemsize
    weight_bytes = 2 * (n_input * n_hidden + 2 * n_hidden * n_hidden
                        + n_hidden * n_output) + 4 * (3 * n_hidden + n_output)
    cost = pl.CostEstimate(
        flops=2 * B * (n_input * n_hidden + 2 * n_hidden * n_hidden
                       + n_hidden * n_output),
        transcendentals=B * (3 * n_hidden + n_output),          # one exp per sigmoid elem
        bytes_accessed=B * (n_input * itemsize + n_output * 4) + weight_bytes,
    )

    out_t = pl.pallas_call(
        _bernoulli_mn_kernel,
        out_shape=jax.ShapeDtypeStruct((n_output, B), jnp.float32),
        grid_spec=pltpu.PrefetchScalarGridSpec(
            num_scalar_prefetch=0,
            grid=grid,
            in_specs=in_specs,
            out_specs=out_spec,
        ),
        compiler_params=pltpu.CompilerParams(
            dimension_semantics=("parallel",)),   # megacore-shardable batch axis
        cost_estimate=cost,
    )(theta_t,
      w_in_t, b_in_t, w_h0_t, b_h0_t, w_h1_t, b_h1_t, w_out_t, b_out_t)

    if n_output == 1:
        # (1, B) -> (B, 1) is a pure reinterpretation: free reshape, never a transpose.
        return out_t.reshape(B, n_output)
    return out_t.T


def init_params(key, n_input=4, n_output=1, n_hidden_units=20):
    """Deterministic init mimicking torch.nn.Linear (uniform +-1/sqrt(fan_in)).

    Weights are returned in (in_features, out_features) layout, biases as (1, out).
    """
    def linear(k, fan_in, fan_out):
        kw, kb = jax.random.split(k)
        bound = 1.0 / jnp.sqrt(jnp.float32(fan_in))
        w = jax.random.uniform(kw, (fan_in, fan_out), jnp.float32, -bound, bound)
        b = jax.random.uniform(kb, (1, fan_out), jnp.float32, -bound, bound)
        return w, b

    k0, k1, k2, k3 = jax.random.split(key, 4)
    w_in, b_in = linear(k0, n_input, n_hidden_units)
    w_h0, b_h0 = linear(k1, n_hidden_units, n_hidden_units)
    w_h1, b_h1 = linear(k2, n_hidden_units, n_hidden_units)
    w_out, b_out = linear(k3, n_hidden_units, n_output)
    return dict(w_in=w_in, b_in=b_in, w_h0=w_h0, b_h0=b_h0,
                w_h1=w_h1, b_h1=b_h1, w_out=w_out, b_out=b_out)


def reference_forward(theta, p, *, mirror_bf16=False):
    """Pure-JAX reference of BernoulliMN.forward.

    mirror_bf16=True mirrors the kernel's quantization: bf16 inputs/weights/activations
    into each matmul, f32 accumulation, f32 bias add + sigmoid.
    """
    if not mirror_bf16:
        h = jax.nn.sigmoid(theta @ p["w_in"] + p["b_in"])
        h = jax.nn.sigmoid(h @ p["w_h0"] + p["b_h0"])
        h = jax.nn.sigmoid(h @ p["w_h1"] + p["b_h1"])
        return jax.nn.sigmoid(h @ p["w_out"] + p["b_out"])

    bf = jnp.bfloat16

    def layer(x, w, b):
        z = jnp.dot(x.astype(bf), w.astype(bf),
                    preferred_element_type=jnp.float32) + b
        return jax.nn.sigmoid(z)

    h = layer(theta, p["w_in"], p["b_in"]).astype(bf)
    h = layer(h, p["w_h0"], p["b_h0"]).astype(bf)
    h = layer(h, p["w_h1"], p["b_h1"]).astype(bf)
    return layer(h, p["w_out"], p["b_out"])


if __name__ == "__main__":
    key = jax.random.PRNGKey(0)
    k_theta, k_params = jax.random.split(key)

    B, n_input, n_hidden, n_output = 512, 4, 20, 1
    theta = jax.random.normal(k_theta, (B, n_input), jnp.float32)
    params = init_params(k_params, n_input=n_input, n_output=n_output,
                         n_hidden_units=n_hidden)

    # Default tile selection: B=512 -> TB=256, 2 balanced grid steps.
    p_kernel = bernoulli_mn_forward(theta, params)
    p_kernel = jax.block_until_ready(p_kernel)
    assert p_kernel.shape == (B, n_output)

    # Reference mirroring the kernel's bf16 quantization -> tight tolerance.
    p_ref_bf16 = reference_forward(theta, params, mirror_bf16=True)
    assert jnp.allclose(p_kernel, p_ref_bf16, atol=2e-3, rtol=2e-3), (
        "Pallas output mismatch vs bf16-mirrored JAX reference")

    # Pure-f32 module semantics -> bf16 quantization stays small for this net.
    p_ref_f32 = reference_forward(theta, params)
    assert jnp.allclose(p_kernel, p_ref_f32, atol=2e-2, rtol=2e-2), (
        "Pallas output drifted too far from f32 module semantics")

    # Explicit single fat tile (1-step grid, full-batch block) also works.
    p_kernel_1step = jax.block_until_ready(
        bernoulli_mn_forward(theta, params, batch_tile=B))
    assert jnp.allclose(p_kernel_1step, p_ref_bf16, atol=2e-3, rtol=2e-3)

    # Pre-transposed-theta path (no wrapper transpose HBM pass).
    theta_t_bf16 = theta.astype(jnp.bfloat16).T
    p_kernel_t = jax.block_until_ready(
        bernoulli_mn_forward(theta_t_bf16, params, theta_is_transposed=True))
    assert jnp.allclose(p_kernel_t, p_ref_bf16, atol=2e-3, rtol=2e-3)

    # TODO(synk): log_prob / sample (Bernoulli distribution ops) are thin wrappers
    # around this forward pass and are left in plain JAX (not part of the hot path).

    print("KERNEL_OK")
</pallas_src>

<mosaic_0001>
module attributes {stable_mosaic.version = 11 : i64} {
  func.func @_bernoulli_mn_kernel(%arg0: i32, %arg1: memref<4x256xbf16, #tpu.memory_space<vmem>>, %arg2: memref<20x4xbf16, #tpu.memory_space<vmem>>, %arg3: memref<20x1xf32, #tpu.memory_space<vmem>>, %arg4: memref<20x20xbf16, #tpu.memory_space<vmem>>, %arg5: memref<20x1xf32, #tpu.memory_space<vmem>>, %arg6: memref<20x20xbf16, #tpu.memory_space<vmem>>, %arg7: memref<20x1xf32, #tpu.memory_space<vmem>>, %arg8: memref<1x20xbf16, #tpu.memory_space<vmem>>, %arg9: memref<1x1xf32, #tpu.memory_space<vmem>>, %arg10: memref<1x256xf32, #tpu.memory_space<vmem>>) attributes {dimension_semantics = [#tpu.dimension_semantics<parallel>], iteration_bounds = array<i64: 2>, scalar_prefetch = 0 : i64, scratch_operands = 0 : i64, tpu.core_type = #tpu.core_type<tc>, window_params = [{transform_indices = @transform_0, window_bounds = array<i64: 4, 256>}, {pipeline_mode = #tpu.pipeline_mode<synchronous>, transform_indices = @transform_1, window_bounds = array<i64: 20, 4>}, {pipeline_mode = #tpu.pipeline_mode<synchronous>, transform_indices = @transform_2, window_bounds = array<i64: 20, 1>}, {pipeline_mode = #tpu.pipeline_mode<synchronous>, transform_indices = @transform_3, window_bounds = array<i64: 20, 20>}, {pipeline_mode = #tpu.pipeline_mode<synchronous>, transform_indices = @transform_4, window_bounds = array<i64: 20, 1>}, {pipeline_mode = #tpu.pipeline_mode<synchronous>, transform_indices = @transform_5, window_bounds = array<i64: 20, 20>}, {pipeline_mode = #tpu.pipeline_mode<synchronous>, transform_indices = @transform_6, window_bounds = array<i64: 20, 1>}, {pipeline_mode = #tpu.pipeline_mode<synchronous>, transform_indices = @transform_7, window_bounds = array<i64: 1, 20>}, {pipeline_mode = #tpu.pipeline_mode<synchronous>, transform_indices = @transform_8, window_bounds = array<i64: 1, 1>}, {transform_indices = @transform_9, window_bounds = array<i64: 1, 256>}]} {
    %c0 = arith.constant 0 : index
    %c0_0 = arith.constant 0 : index
    %0 = vector.load %arg1[%c0, %c0_0] : memref<4x256xbf16, #tpu.memory_space<vmem>>, vector<4x256xbf16>
    %c0_1 = arith.constant 0 : index
    %c0_2 = arith.constant 0 : index
    %1 = vector.load %arg2[%c0_1, %c0_2] : memref<20x4xbf16, #tpu.memory_space<vmem>>, vector<20x4xbf16>
    %cst = arith.constant dense<0.000000e+00> : vector<20x256xf32>
    %2 = tpu.matmul %1, %0, %cst {dimension_numbers = #tpu.dot_dimension_numbers<[1], [0], [0], [1], [0, 0, 1, 1], [], []>} : vector<20x4xbf16>, vector<4x256xbf16>, vector<20x256xf32> -> vector<20x256xf32>
    %c0_3 = arith.constant 0 : index
    %c0_4 = arith.constant 0 : index
    %3 = vector.load %arg3[%c0_3, %c0_4] : memref<20x1xf32, #tpu.memory_space<vmem>>, vector<20x1xf32>
    %4 = vector.broadcast %3 : vector<20x1xf32> to vector<20x256xf32>
    %5 = arith.addf %2, %4 : vector<20x256xf32>
    %6 = arith.negf %5 : vector<20x256xf32>
    %7 = math.exp %6 : vector<20x256xf32>
    %cst_5 = arith.constant 1.000000e+00 : f32
    %8 = vector.broadcast %cst_5 : f32 to vector<20x256xf32>
    %9 = arith.addf %8, %7 : vector<20x256xf32>
    %10 = arith.divf %8, %9 : vector<20x256xf32>
    %11 = arith.truncf %10 : vector<20x256xf32> to vector<20x256xbf16>
    %c0_6 = arith.constant 0 : index
    %c0_7 = arith.constant 0 : index
    %12 = vector.load %arg4[%c0_6, %c0_7] : memref<20x20xbf16, #tpu.memory_space<vmem>>, vector<20x20xbf16>
    %cst_8 = arith.constant dense<0.000000e+00> : vector<20x256xf32>
    %13 = tpu.matmul %12, %11, %cst_8 {dimension_numbers = #tpu.dot_dimension_numbers<[1], [0], [0], [1], [0, 0, 1, 1], [], []>} : vector<20x20xbf16>, vector<20x256xbf16>, vector<20x256xf32> -> vector<20x256xf32>
    %c0_9 = arith.constant 0 : index
    %c0_10 = arith.constant 0 : index
    %14 = vector.load %arg5[%c0_9, %c0_10] : memref<20x1xf32, #tpu.memory_space<vmem>>, vector<20x1xf32>
    %15 = vector.broadcast %14 : vector<20x1xf32> to vector<20x256xf32>
    %16 = arith.addf %13, %15 : vector<20x256xf32>
    %17 = arith.negf %16 : vector<20x256xf32>
    %18 = math.exp %17 : vector<20x256xf32>
    %cst_11 = arith.constant 1.000000e+00 : f32
    %19 = vector.broadcast %cst_11 : f32 to vector<20x256xf32>
    %20 = arith.addf %19, %18 : vector<20x256xf32>
    %21 = arith.divf %19, %20 : vector<20x256xf32>
    %22 = arith.truncf %21 : vector<20x256xf32> to vector<20x256xbf16>
    %c0_12 = arith.constant 0 : index
    %c0_13 = arith.constant 0 : index
    %23 = vector.load %arg6[%c0_12, %c0_13] : memref<20x20xbf16, #tpu.memory_space<vmem>>, vector<20x20xbf16>
    %cst_14 = arith.constant dense<0.000000e+00> : vector<20x256xf32>
    %24 = tpu.matmul %23, %22, %cst_14 {dimension_numbers = #tpu.dot_dimension_numbers<[1], [0], [0], [1], [0, 0, 1, 1], [], []>} : vector<20x20xbf16>, vector<20x256xbf16>, vector<20x256xf32> -> vector<20x256xf32>
    %c0_15 = arith.constant 0 : index
    %c0_16 = arith.constant 0 : index
    %25 = vector.load %arg7[%c0_15, %c0_16] : memref<20x1xf32, #tpu.memory_space<vmem>>, vector<20x1xf32>
    %26 = vector.broadcast %25 : vector<20x1xf32> to vector<20x256xf32>
    %27 = arith.addf %24, %26 : vector<20x256xf32>
    %28 = arith.negf %27 : vector<20x256xf32>
    %29 = math.exp %28 : vector<20x256xf32>
    %cst_17 = arith.constant 1.000000e+00 : f32
    %30 = vector.broadcast %cst_17 : f32 to vector<20x256xf32>
    %31 = arith.addf %30, %29 : vector<20x256xf32>
    %32 = arith.divf %30, %31 : vector<20x256xf32>
    %33 = arith.truncf %32 : vector<20x256xf32> to vector<20x256xbf16>
    %c0_18 = arith.constant 0 : index
    %c0_19 = arith.constant 0 : index
    %34 = vector.load %arg8[%c0_18, %c0_19] : memref<1x20xbf16, #tpu.memory_space<vmem>>, vector<1x20xbf16>
    %cst_20 = arith.constant dense<0.000000e+00> : vector<1x256xf32>
    %35 = tpu.matmul %34, %33, %cst_20 {dimension_numbers = #tpu.dot_dimension_numbers<[1], [0], [0], [1], [0, 0, 1, 1], [], []>} : vector<1x20xbf16>, vector<20x256xbf16>, vector<1x256xf32> -> vector<1x256xf32>
    %c0_21 = arith.constant 0 : index
    %c0_22 = arith.constant 0 : index
    %36 = vector.load %arg9[%c0_21, %c0_22] : memref<1x1xf32, #tpu.memory_space<vmem>>, vector<1x1xf32>
    %37 = vector.broadcast %36 : vector<1x1xf32> to vector<1x256xf32>
    %38 = arith.addf %35, %37 : vector<1x256xf32>
    %39 = arith.negf %38 : vector<1x256xf32>
    %40 = math.exp %39 : vector<1x256xf32>
    %cst_23 = arith.constant 1.000000e+00 : f32
    %41 = vector.broadcast %cst_23 : f32 to vector<1x256xf32>
    %42 = arith.addf %41, %40 : vector<1x256xf32>
    %43 = arith.divf %41, %42 : vector<1x256xf32>
    %c0_24 = arith.constant 0 : index
    %c0_25 = arith.constant 0 : index
    %44 = vector.load %arg10[%c0_24, %c0_25] : memref<1x256xf32, #tpu.memory_space<vmem>>, vector<1x256xf32>
    tpu.vector_store %arg10[%c0_24, %c0_25], %43 {strides = array<i32>} : memref<1x256xf32, #tpu.memory_space<vmem>>, vector<1x256xf32>,
    return
  }
  func.func @transform_0(%arg0: i32) -> (i32, i32) {
    %c0_i32 = arith.constant 0 : i32
    %c0_i32_0 = arith.constant 0 : i32
    return %c0_i32, %arg0 : i32, i32
  }
  func.func @transform_1(%arg0: i32) -> (i32, i32) {
    %c0_i32 = arith.constant 0 : i32
    %c0_i32_0 = arith.constant 0 : i32
    %c0_i32_1 = arith.constant 0 : i32
    return %c0_i32, %c0_i32_0 : i32, i32
  }
  func.func @transform_2(%arg0: i32) -> (i32, i32) {
    %c0_i32 = arith.constant 0 : i32
    %c0_i32_0 = arith.constant 0 : i32
    %c0_i32_1 = arith.constant 0 : i32
    return %c0_i32, %c0_i32_0 : i32, i32
  }
  func.func @transform_3(%arg0: i32) -> (i32, i32) {
    %c0_i32 = arith.constant 0 : i32
    %c0_i32_0 = arith.constant 0 : i32
    %c0_i32_1 = arith.constant 0 : i32
    return %c0_i32, %c0_i32_0 : i32, i32
  }
  func.func @transform_4(%arg0: i32) -> (i32, i32) {
    %c0_i32 = arith.constant 0 : i32
    %c0_i32_0 = arith.constant 0 : i32
    %c0_i32_1 = arith.constant 0 : i32
    return %c0_i32, %c0_i32_0 : i32, i32
  }
  func.func @transform_5(%arg0: i32) -> (i32, i32) {
    %c0_i32 = arith.constant 0 : i32
    %c0_i32_0 = arith.constant 0 : i32
    %c0_i32_1 = arith.constant 0 : i32
    return %c0_i32, %c0_i32_0 : i32, i32
  }
  func.func @transform_6(%arg0: i32) -> (i32, i32) {
    %c0_i32 = arith.constant 0 : i32
    %c0_i32_0 = arith.constant 0 : i32
    %c0_i32_1 = arith.constant 0 : i32
    return %c0_i32, %c0_i32_0 : i32, i32
  }
  func.func @transform_7(%arg0: i32) -> (i32, i32) {
    %c0_i32 = arith.constant 0 : i32
    %c0_i32_0 = arith.constant 0 : i32
    %c0_i32_1 = arith.constant 0 : i32
    return %c0_i32, %c0_i32_0 : i32, i32
  }
  func.func @transform_8(%arg0: i32) -> (i32, i32) {
    %c0_i32 = arith.constant 0 : i32
    %c0_i32_0 = arith.constant 0 : i32
    %c0_i32_1 = arith.constant 0 : i32
    return %c0_i32, %c0_i32_0 : i32, i32
  }
  func.func @transform_9(%arg0: i32) -> (i32, i32) {
    %c0_i32 = arith.constant 0 : i32
    %c0_i32_0 = arith.constant 0 : i32
    return %c0_i32, %arg0 : i32, i32
  }
}

</mosaic_0001>

<bundles_post_ra>
// kernel: tpu_custom_call.1
= control target key start
LH: loop header
LB: loop body
LE: loop exit
PB: predicated region body
PF: predicated region fallthrough
CT: control target
= control target key end

     0   :  { %s1884_s0 = inlined_call_operand.vmem [shape: bf16[4,512], index: 0, kind: input, shape index: {}]   ;;  %s1885_s1 = inlined_call_operand.vmem [shape: bf16[20,4], index: 1, kind: input, shape index: {}]   ;;  %s1886_s2 = inlined_call_operand.vmem [shape: f32[20,1], index: 2, kind: input, shape index: {}]   ;;  %s1887_s3 = inlined_call_operand.vmem [shape: bf16[20,20], index: 3, kind: input, shape index: {}]   ;;  %s1888_s4 = inlined_call_operand.vmem [shape: f32[20,1], index: 4, kind: input, shape index: {}]   ;;  %s1889_s5 = inlined_call_operand.vmem [shape: bf16[20,20], index: 5, kind: input, shape index: {}]   ;;  %s1890_s6 = inlined_call_operand.vmem [shape: f32[20,1], index: 6, kind: input, shape index: {}]   ;;  %s1891_s7 = inlined_call_operand.vmem [shape: bf16[1,20], index: 7, kind: input, shape index: {}]   ;;  %s1892_s8 = inlined_call_operand.<no memory space> [shape: f32[1,1], index: 8, kind: input, shape index: {}]   ;;  %s1893_s9 = inlined_call_operand.hbm [shape: f32[1,512], index: 9, kind: output, shape index: {}]  }
   0x1   :  { %v14_v0 = vstv %s1892_s8 }
   0x2   :  { %15 = vst [vmem:[#allocation2] sm:$0x1] %v14_v0 }
   0x3   :  { %16 = vsyncpa [#allocation4], 0 }
   0x4   :  { %18 = vsyncpa [#allocation4 + $0x1], 0  ;;  %s1396_s11 = smov 0   ;;  %s1398_s12 = smov 0  }
   0x5   :  { %s1400_s13 = smov 0   ;;  %s1402_s14 = smov 0  }
   0x6 LB: > { %s1094_s8 = sadd.s32 4294967295, %s1340_s14   ;;  %s1095_s15 = sadd.s32 4294967294, %s1340_s14   ;;  %s1340_s14 = sphi %s1402_s14, %s1928_s14   ;;  %s1336_s13 = sphi %s1400_s13, %s1927_s13   ;;  %s1332_s12 = sphi %s1398_s12, %s1926_s12   ;;  %s1328_s11 = sphi %s1396_s11, %s1925_s11  }
   0x7   : > { %s1419_s16 = sadd.s32 1, %s1340_s14   ;;  %s225_s17 = sadd.s32 1, %s1336_s13 }
   0x8   : > { %s222_s18 = ssub.s32 %s1340_s14, %s1419_s16  ;;  %p235_p0 = scmp.ne.s32.totalorder %s1336_s13, %s1332_s12 }
   0x9   : > { %p223_p1 = scmp.eq.s32.totalorder %s222_s18, 0  ;;  %p236_p2 = scmp.eq.s32.totalorder %s1094_s8, 1 }
   0xa   : > { %p241_p3 = scmp.ne.s32.totalorder %s1332_s12, %s1328_s11  ;;  %p242_p4 = scmp.eq.s32.totalorder %s1095_s15, 1 }
   0xb   : > { %s1429_s19 = scalar_select %p223_p1, %s1336_s13, %s225_s17  }
   0xc   : > { %p1431_p5 = por %p236_p2, %p235_p0  ;;  %p1435_p6 = por %p242_p4, %p241_p3 }
   0xd   : > { %p1098_p7 = scmp.ge.s32.totalorder %s1340_s14, 1  ;;  %p293_p8 = scmp.lt.s32.totalorder %s1340_s14, 3 }
   0xf   : > { %p294_p9 = pnand %p1098_p7, %p293_p8 }
  0x10   : > { %s1441_s22 = sshll.u32 (!%p294_p9), %s1094_s8, 1  ;;  %s326_s17 = sand.u32 (!%p294_p9), 1, %s1332_s12  }
  0x11   : > { %297 = sbr.rel (%p294_p9) target bundleno = 761 (0x2f9), region = 56  ;;  %p330_p10 = scmp.lt.s32.totalorder (!%p294_p9), %s1441_s22, 3 }
  0x12   : > { %s1842_s18 = sshll.u32 (!%p294_p9), %s326_s17, 1  ;;  %s1031_s25 = scalar_lea.hbm (!%p294_p9), %s1893_s9, %s1441_s22 }
  0x13   : > { %s328_s26 = scalar_lea.vmem (!%p294_p9), [#allocation3], %s1842_s18  ;;  %s1298_s15 = scalar_lea.hbm (!%p294_p9), %s1893_s9, 4 }
  0x16   : > { %v343_v1 = vld [vmem:[%s1886_s2 + $0x10] sm:$0xf]  ;;  %v1342_v2 = vmov 0   ;;  %v342_v3 = vld [vmem:[%s1886_s2 + $0x8] sm:$0xff]  ;;  %s331_s27 = scalar_select %p330_p10, %s1441_s22, 3  ;;  %v341_v5 = vld [vmem:[%s1886_s2] sm:$0xff] }
  0x17   : > { %1195 = vset.pattern.permute.xlu0 %v1342_v2  ;;  %1196 = vset.pattern.permute.xlu1 %v1342_v2  ;;  %v542_v6 = vld [vmem:[%s1888_s4 + $0x10] sm:$0xf]  ;;  %vm378_vm0 = vcmask 1041408   ;;  %v736_v8 = vld [vmem:[%s1890_s6] sm:$0xff]  ;;  %vm371_vm1 = vcmask 31744   ;;  %s1021_s22 = scalar_lea.sflag [#allocation4], %s326_s17 }
  0x18   : > { %356 = vperm.xlu0 %1195, %v343_v1   ;;  %351 = vperm.xlu1 %1196, %v342_v3   ;;  %s1101_s28 = sshll.u32 %s331_s27, 1  ;;  %v738_v7 = vld [vmem:[%s1890_s6 + $0x10] sm:$0xf]  ;;  %v1152_v13 = vld [vmem:[%s1885_s1] sm:$0xff]  ;;  %v929_v14 = vld [vmem:[#allocation2] sm:$0x1] }
  0x19   : > { %1197 = vset.pattern.permute.xlu2 %v1342_v2  ;;  %s333_s10 = scalar_lea.vmem %s1884_s0, %s1101_s28  ;;  %v340_v15 = vld [vmem:[%s1885_s1 + $0x8] sm:$0x3]  ;;  %s1033_s27 = sshll.u32 %s328_s26, 4  ;;  %s1034_s27 = int_to_ptr.vmem [resolvable:$true] %s1033_s27 }
  0x1a   : > { %v337_v4 = vld [vmem:[%s333_s10] sm:$0xf]  ;;  %v364_v16 = vunpack.c.l.b16 %v340_v15  ;;  %s1035_s28 = sshll.u32 %s1031_s25, 4  ;;  %s1036_s28 = int_to_ptr.hbm [resolvable:$true] %s1035_s28 }
  0x1b   : > { %368 = vst [vmem:[#allocation1] ss:$4 sm:$0xff] %v337_v4  ;;  %s1292_s29 = sshra.s32 %s1036_s28, 4  ;;  %s1293_s29 = int_to_ptr.hbm [resolvable:$true] %s1292_s29 }
  0x1c   : > { %v366_v17 = vpack.c.b16 %v364_v16, %v364_v16  ;;  %s1294_s30 = scalar_lea.hbm %s1293_s29, 2  ;;  %p1299_p0 = scmp.lt.s32.totalorder %s1293_s29, %s1893_s9 }
  0x1d   : > { %p1295_p11 = scmp.ne.s32.totalorder %s1293_s29, %s1294_s30  ;;  %p1300_p1 = scmp.lt.s32.totalorder %s1298_s15, %s1294_s30 }
  0x1f   : > { %p1296_p12 = pnand %p1295_p11, %p1431_p5  ;;  %p1301_p2 = por %p1300_p1, %p1299_p0 }
  0x20   : > { %346 = vperm.xlu0 %1195, %v341_v5   ;;  %555 = vperm.xlu1 %1196, %v542_v6  }
  0x21   : > { %p1297_p13 = pneg %p1296_p12 }
  0x22   : > { %v369_v9 = vld.sshfl [vmem:[#allocation1] sm:$0xff pattern:$0x73625140]  ;;  %v370_v10 = vld.sshfl [vmem:[#allocation1 + $0x8] sm:$0xff pattern:$0x73625140] }
  0x23   : > { %v379_v11 = vsel %vm378_vm0, %v369_v9, 0  ;;  %v381_v12 = vsel %vm378_vm0, %v370_v10, 0  ;;  %p1302_p3 = pnand %p1301_p2, %p1297_p13 }
  0x24   : > { %390 = vmatpush.bf16.msra.mxu0 %v379_v11  ;;  %408 = vmatpush.bf16.msra.mxu1 %v381_v12 }
  0x27   : > { %1106 = vmatmul.msk.bf16.vlgmr.msra.gmra.mxu0 %vm371_vm1, %v1152_v13  ;;  %1108 = vmatmul.msk.bf16.vlgmr.msra.gmra.mxu1 %vm371_vm1, %v1152_v13 }
  0x28   : > { %751 = vperm.xlu0 %1195, %v738_v7   ;;  %741 = vperm.xlu1 %1196, %v736_v8  }
  0x30   : > { %932 = vperm.xlu0 %1195, %v929_v14  }
  0x37   : > { %1107 = vmatmul.msk.bf16.gmra.mxu0 %vm371_vm1, %v366_v17  ;;  %1109 = vmatmul.msk.bf16.gmra.mxu1 %vm371_vm1, %v366_v17 }
  0x8a   : > { %v357_v18 = vpop.permute.xlu0 %356  ;;  %v352_v26 = vpop.permute.xlu1 %351 }
  0x92   : > { %v347_v19 = vpop.permute.xlu0 %346 }
  0xa4   : > { %v392_v20 = vpop.f32.mrf.mxu0  ;;  %v410_v21 = vpop.f32.mrf.mxu1 }
  0xa5   : > { %v393_v22 = vadd.f32 %v392_v20, %v347_v19  ;;  %v411_v23 = vadd.f32 %v410_v21, %v347_v19 }
  0xa7   : > { %v1110_v24 = vmul.f32 -1.442695, %v393_v22  ;;  %v1111_v25 = vmul.f32 -1.442695, %v411_v23 }
  0xa9   : > { %1198 = vpow2.f32 %v1110_v24 }
  0xaa   : > { %1200 = vpow2.f32 %v1111_v25 }
  0xac   : > { %v394_v27 = vpop.f32.mrf.mxu0  ;;  %v412_v28 = vpop.f32.mrf.mxu1 }
  0xad   : > { %v395_v29 = vadd.f32 %v394_v27, %v352_v26  ;;  %v413_v30 = vadd.f32 %v412_v28, %v352_v26 }
  0xaf   : > { %v1112_v31 = vmul.f32 -1.442695, %v395_v29  ;;  %v1199_v32 = vpop.eup %1198  ;;  %v1113_v33 = vmul.f32 -1.442695, %v413_v30  ;;  %v540_v29 = vld [vmem:[%s1888_s4] sm:$0xff] }
  0xb0   : > { %v1201_v34 = vpop.eup %1200  ;;  %v1474_v35 = vadd.f32 1.0, %v1199_v32  ;;  %545 = vperm.xlu2 %1197, %v540_v29  }
  0xb1   : > { %1202 = vpow2.f32 %v1112_v31  ;;  %v1476_v36 = vadd.f32 1.0, %v1201_v34 }
  0xb2   : > { %1204 = vpow2.f32 %v1113_v33  ;;  %v454_v59 = vand.u32 2147483648, %v1474_v35  ;;  %vm448_vm2 = vweird.f32 %v1474_v35  ;;  %v452_v0 = vand.u32 2147483647, %v1474_v35 }
  0xb3   : > { %1206 = vrcp.f32 %v1474_v35  ;;  %v467_v1 = vand.u32 2147483647, %v1476_v36  ;;  %v469_v5 = vand.u32 2147483648, %v1476_v36  ;;  %vm463_vm7 = vweird.f32 %v1476_v36 }
  0xb4   : > { %v397_v37 = vpop.f32.mrf.mxu0  ;;  %v415_v38 = vpop.f32.mrf.mxu1  ;;  %1208 = vrcp.f32 %v1476_v36  ;;  %v1509_v3 = vor.u32 1.1754944e-38, %v454_v59 }
  0xb5   : > { %v398_v39 = vadd.f32 %v397_v37, %v357_v18  ;;  %v416_v40 = vadd.f32 %v415_v38, %v357_v18  ;;  %v470_v59 = vor.u32 1.1754944e-38, %v469_v5 }
  0xb7   : > { %v1203_v41 = vpop.eup %1202  ;;  %v1114_v42 = vmul.f32 -1.442695, %v398_v39  ;;  %v1115_v43 = vmul.f32 -1.442695, %v416_v40 }
  0xb8   : > { %v1480_v44 = vadd.f32 1.0, %v1203_v41  ;;  %v1205_v45 = vpop.eup %1204 }
  0xb9   : > { %1210 = vpow2.f32 %v1114_v42  ;;  %v1483_v46 = vadd.f32 1.0, %v1205_v45  ;;  %v1485_v49 = vpop.eup %1206 }
  0xba   : > { %1212 = vrcp.f32 %v1480_v44  ;;  %v1488_v50 = vpop.eup %1208  ;;  %v444_v56 = vmul.f32 %v1485_v49, %v1474_v35  ;;  %vm449_vm3 = vweird.f32 %v1485_v49  ;;  %vm478_vm4 = vweird.f32 %v1480_v44 }
  0xbb   : > { %1214 = vpow2.f32 %v1115_v43  ;;  %v459_v60 = vmul.f32 %v1488_v50, %v1476_v36  ;;  %v482_v8 = vand.u32 2147483647, %v1480_v44  ;;  %v484_v12 = vand.u32 2147483648, %v1480_v44  ;;  %vm1534_vm12 = vmor %vm448_vm2, %vm449_vm3  ;;  %v539_v36 = vld [vmem:[%s1887_s3 + $0x8] sm:$0x3] }
  0xbc   : > { %v399_v47 = vpop.f32.mrf.mxu0  ;;  %v417_v48 = vpop.f32.mrf.mxu1  ;;  %1216 = vrcp.f32 %v1483_v46  ;;  %v445_v61 = vsub.f32 1.0, %v444_v56  ;;  %vm464_vm5 = vweird.f32 %v1488_v50  ;;  %vm493_vm6 = vweird.f32 %v1483_v46 }
  0xbd   : > { %v460_v4 = vsub.f32 1.0, %v459_v60  ;;  %v497_v15 = vand.u32 2147483647, %v1483_v46  ;;  %v499_v19 = vand.u32 2147483648, %v1483_v46  ;;  %v485_v45 = vor.u32 1.1754944e-38, %v484_v12 }
  0xbe   : > { %v446_v10 = vmul.f32 %v1485_v49, %v445_v61 }
  0xbf   : > { %v1211_v51 = vpop.eup %1210  ;;  %v461_v17 = vmul.f32 %v1488_v50, %v460_v4 }
  0xc0   : > { %v1490_v52 = vpop.eup %1212  ;;  %v441_v53 = vadd.f32 1.0, %v1211_v51  ;;  %v447_v31 = vadd.f32 %v1485_v49, %v446_v10 }
  0xc1   : > { %v1215_v54 = vpop.eup %1214  ;;  %v474_v57 = vmul.f32 %v1490_v52, %v1480_v44  ;;  %vm479_vm10 = vweird.f32 %v1490_v52  ;;  %v462_v41 = vadd.f32 %v1488_v50, %v461_v17 }
  0xc2   : > { %1218 = vrcp.f32 %v441_v53  ;;  %v1492_v55 = vadd.f32 1.0, %v1215_v54  ;;  %v1498_v58 = vpop.eup %1216  ;;  %v514_v16 = vand.u32 2147483648, %v441_v53  ;;  %v512_v21 = vand.u32 2147483647, %v441_v53  ;;  %vm1549_vm2 = vmor %vm478_vm4, %vm479_vm10 }
  0xc3   : > { %v475_v62 = vsub.f32 1.0, %v474_v57  ;;  %v489_v63 = vmul.f32 %v1498_v58, %v1483_v46  ;;  %vm508_vm9 = vweird.f32 %v441_v53  ;;  %vm494_vm14 = vweird.f32 %v1498_v58 }
  0xc4   : > { %1220 = vrcp.f32 %v1492_v55  ;;  %v529_v23 = vand.u32 2147483648, %v1492_v55  ;;  %v527_v27 = vand.u32 2147483647, %v1492_v55  ;;  %v515_v30 = vor.u32 1.1754944e-38, %v514_v16  ;;  %vm1562_vm4 = vmor %vm493_vm6, %vm494_vm14 }
  0xc5   : > { %v490_v6 = vsub.f32 1.0, %v489_v63  ;;  %v476_v11 = vmul.f32 %v1490_v52, %v475_v62  ;;  %vm513_vm15 = vcmp.eq.f32.partialorder %v512_v21, 8.507059e+37  ;;  %vm523_vm1 = vweird.f32 %v1492_v55  ;;  %vm1577_vm6 = vmor %vm463_vm7, %vm464_vm5  ;;  %v737_v63 = vld [vmem:[%s1890_s6 + $0x8] sm:$0xff] }
  0xc6   : > { %v530_v39 = vor.u32 1.1754944e-38, %v529_v23  ;;  %v451_v48 = vsel %vm1534_vm12, %v1485_v49, %v447_v31  ;;  %v541_v49 = vld [vmem:[%s1888_s4 + $0x8] sm:$0xff]  ;;  %vm453_vm10 = vcmp.eq.f32.partialorder %v452_v0, 8.507059e+37  ;;  %v466_v56 = vsel %vm1577_vm6, %v1488_v50, %v462_v41  ;;  %v1153_v50 = vld [vmem:[%s1887_s3] sm:$0xff] }
  0xc7   : > { %v491_v18 = vmul.f32 %v1498_v58, %v490_v6  ;;  %v477_v24 = vadd.f32 %v1490_v52, %v476_v11  ;;  %vm468_vm5 = vcmp.eq.f32.partialorder %v467_v1, 8.507059e+37  ;;  %550 = vperm.xlu2 %1197, %v541_v49   ;;  %vm1894_vm7 = vcmask 162816  }
  0xc8   : > { %v1219_v2 = vpop.eup %1218  ;;  %v471_v35 = vsel %vm468_vm5, %v470_v59, %v466_v56  ;;  %v563_v0 = vunpack.c.l.b16 %v539_v36 }
  0xc9   : > { %v504_v7 = vmul.f32 %v1219_v2, %v441_v53  ;;  %vm509_vm8 = vweird.f32 %v1219_v2  ;;  %v492_v32 = vadd.f32 %v1498_v58, %v491_v18  ;;  %v481_v40 = vsel %vm1549_vm2, %v1490_v52, %v477_v24 }
  0xca   : > { %v1221_v9 = vpop.eup %1220  ;;  %vm510_vm13 = vmor %vm508_vm9, %vm509_vm8  ;;  %vm528_vm8 = vcmp.eq.f32.partialorder %v527_v27, 8.507059e+37  ;;  %vm483_vm9 = vcmp.eq.f32.partialorder %v482_v8, 8.507059e+37  ;;  %v565_v1 = vpack.c.b16 %v563_v0, %v563_v0 }
  0xcb   : > { %v505_v13 = vsub.f32 1.0, %v504_v7  ;;  %v519_v14 = vmul.f32 %v1221_v9, %v1492_v55  ;;  %vm524_vm11 = vweird.f32 %v1221_v9  ;;  %v496_v51 = vsel %vm1562_vm4, %v1498_v58, %v492_v32 }
  0xcc   : > { %vm525_vm3 = vmor %vm523_vm1, %vm524_vm11  ;;  %v486_v54 = vsel %vm483_vm9, %v485_v45, %v481_v40  ;;  %v500_v55 = vor.u32 1.1754944e-38, %v499_v19  ;;  %vm498_vm11 = vcmp.eq.f32.partialorder %v497_v15, 8.507059e+37  ;;  %v456_v58 = vsel %vm453_vm10, %v1509_v3, %v451_v48  ;;  %v556_v19 = vpop.permute.xlu1 %555 }
  0xcd   : > { %v506_v20 = vmul.f32 %v1219_v2, %v505_v13  ;;  %v520_v22 = vsub.f32 1.0, %v519_v14  ;;  %v533_v61 = vpack.c.bf16 %v486_v54, %v456_v58 }
  0xce   : > { %v501_v60 = vsel %vm498_vm11, %v500_v55, %v496_v51 }
  0xcf   : > { %v507_v25 = vadd.f32 %v1219_v2, %v506_v20  ;;  %v521_v26 = vmul.f32 %v1221_v9, %v520_v22  ;;  %v534_v62 = vpack.c.bf16 %v501_v60, %v471_v35  ;;  %746 = vperm.xlu2 %1197, %v737_v63  }
  0xd1   : > { %v511_v33 = vsel %vm510_vm13, %v1219_v2, %v507_v25  ;;  %v522_v34 = vadd.f32 %v1221_v9, %v521_v26 }
  0xd2   : > { %v516_v38 = vsel %vm513_vm15, %v515_v30, %v511_v33 }
  0xd3   : > { %v535_v42 = vpack.c.bf16 %v516_v38, %v516_v38  ;;  %v526_v43 = vsel %vm525_vm3, %v1221_v9, %v522_v34 }
  0xd4   : > { %v531_v47 = vsel %vm528_vm8, %v530_v39, %v526_v43 }
  0xd5   : > { %v574_v52 = vsel %vm378_vm0, %v535_v42, 0  ;;  %v536_v53 = vpack.c.bf16 %v531_v47, %v531_v47 }
  0xd6   : > { %585 = vmatpush.bf16.msra.mxu2 %v574_v52 }
  0xd7   : > { %v577_v57 = vsel %vm378_vm0, %v536_v53, 0 }
  0xd8   : > { %603 = vmatpush.bf16.msra.mxu3 %v577_v57 }
  0xda   : > { %586 = vmatpush.bf16.msra.mxu2 %v533_v61 }
  0xdc   : > { %604 = vmatpush.bf16.msra.mxu3 %v534_v62 }
  0xdd   : > { %1120 = vmatmul.msk.bf16.vlgmr.msra.gmra.mxu2 %vm1894_vm7, %v1153_v50 }
  0xdf   : > { %1122 = vmatmul.msk.bf16.vlgmr.msra.gmra.mxu3 %vm1894_vm7, %v1153_v50 }
  0xed   : > { %1121 = vmatmul.msk.bf16.gmra.mxu2 %vm1894_vm7, %v565_v1 }
  0xef   : > { %1123 = vmatmul.msk.bf16.gmra.mxu3 %vm1894_vm7, %v565_v1 }
 0x10a   : > { %v546_v2 = vpop.permute.xlu2 %545 }
 0x121   : > { %v551_v9 = vpop.permute.xlu2 %550 }
 0x160   : > { %v588_v3 = vpop.f32.mrf.mxu2 }
 0x161   : > { %v589_v4 = vadd.f32 %v588_v3, %v546_v2 }
 0x162   : > { %v606_v5 = vpop.f32.mrf.mxu3 }
 0x163   : > { %v1124_v6 = vmul.f32 -1.442695, %v589_v4  ;;  %v607_v7 = vadd.f32 %v606_v5, %v546_v2 }
 0x165   : > { %v1125_v8 = vmul.f32 -1.442695, %v607_v7  ;;  %1222 = vpow2.f32 %v1124_v6 }
 0x167   : > { %1224 = vpow2.f32 %v1125_v8 }
 0x168   : > { %v590_v10 = vpop.f32.mrf.mxu2 }
 0x169   : > { %v591_v11 = vadd.f32 %v590_v10, %v551_v9 }
 0x16a   : > { %v608_v12 = vpop.f32.mrf.mxu3 }
 0x16b   : > { %v1126_v13 = vmul.f32 -1.442695, %v591_v11  ;;  %v609_v14 = vadd.f32 %v608_v12, %v551_v9  ;;  %v1223_v15 = vpop.eup %1222 }
 0x16c   : > { %v1608_v18 = vadd.f32 1.0, %v1223_v15 }
 0x16d   : > { %v1225_v16 = vpop.eup %1224  ;;  %1226 = vpow2.f32 %v1126_v13  ;;  %v1127_v17 = vmul.f32 -1.442695, %v609_v14 }
 0x16e   : > { %v1610_v20 = vadd.f32 1.0, %v1225_v16  ;;  %v650_v44 = vand.u32 2147483648, %v1608_v18  ;;  %vm644_vm12 = vweird.f32 %v1608_v18  ;;  %v648_v53 = vand.u32 2147483647, %v1608_v18 }
 0x16f   : > { %1228 = vpow2.f32 %v1127_v17 }
 0x170   : > { %v593_v21 = vpop.f32.mrf.mxu2  ;;  %1230 = vrcp.f32 %v1608_v18  ;;  %v663_v54 = vand.u32 2147483647, %v1610_v20  ;;  %v1643_v55 = vor.u32 1.1754944e-38, %v650_v44  ;;  %v665_v56 = vand.u32 2147483648, %v1610_v20 }
 0x171   : > { %v594_v22 = vadd.f32 %v593_v21, %v556_v19  ;;  %1232 = vrcp.f32 %v1610_v20  ;;  %vm659_vm2 = vweird.f32 %v1610_v20 }
 0x172   : > { %v611_v23 = vpop.f32.mrf.mxu3 }
 0x173   : > { %v1227_v24 = vpop.eup %1226  ;;  %v1128_v25 = vmul.f32 -1.442695, %v594_v22  ;;  %v612_v26 = vadd.f32 %v611_v23, %v556_v19 }
 0x174   : > { %v1614_v27 = vadd.f32 1.0, %v1227_v24 }
 0x175   : > { %v1229_v28 = vpop.eup %1228  ;;  %1234 = vpow2.f32 %v1128_v25  ;;  %v1129_v29 = vmul.f32 -1.442695, %v612_v26 }
 0x176   : > { %1236 = vrcp.f32 %v1614_v27  ;;  %v1617_v30 = vadd.f32 1.0, %v1229_v28  ;;  %v1619_v32 = vpop.eup %1230  ;;  %vm674_vm14 = vweird.f32 %v1614_v27  ;;  %v678_v59 = vand.u32 2147483647, %v1614_v27 }
 0x177   : > { %1238 = vpow2.f32 %v1129_v29  ;;  %v1622_v33 = vpop.eup %1232  ;;  %v640_v45 = vmul.f32 %v1619_v32, %v1608_v18  ;;  %vm645_vm13 = vweird.f32 %v1619_v32  ;;  %v680_v35 = vand.u32 2147483648, %v1614_v27  ;;  %v1154_v18 = vld [vmem:[%s1889_s5] sm:$0xff] }
 0x178   : > { %v595_v31 = vpop.f32.mrf.mxu2  ;;  %1240 = vrcp.f32 %v1617_v30  ;;  %v655_v47 = vmul.f32 %v1622_v33, %v1610_v20  ;;  %vm660_vm15 = vweird.f32 %v1622_v33  ;;  %vm689_vm1 = vweird.f32 %v1617_v30  ;;  %vm1668_vm6 = vmor %vm644_vm12, %vm645_vm13  ;;  %v742_v20 = vpop.permute.xlu1 %741 }
 0x179   : > { %v641_v52 = vsub.f32 1.0, %v640_v45  ;;  %v693_v36 = vand.u32 2147483647, %v1617_v30  ;;  %v695_v3 = vand.u32 2147483648, %v1617_v30  ;;  %v681_v28 = vor.u32 1.1754944e-38, %v680_v35 }
 0x17a   : > { %v613_v34 = vpop.f32.mrf.mxu3  ;;  %v656_v49 = vsub.f32 1.0, %v655_v47  ;;  %v735_v47 = vld [vmem:[%s1889_s5 + $0x8] sm:$0x3] }
 0x17b   : > { %v1235_v37 = vpop.eup %1234  ;;  %v642_v63 = vmul.f32 %v1619_v32, %v641_v52 }
 0x17c   : > { %v1624_v38 = vpop.eup %1236  ;;  %v637_v39 = vadd.f32 1.0, %v1235_v37  ;;  %v657_v1 = vmul.f32 %v1622_v33, %v656_v49 }
 0x17d   : > { %v1239_v40 = vpop.eup %1238  ;;  %v670_v42 = vmul.f32 %v1624_v38, %v1614_v27  ;;  %vm675_vm4 = vweird.f32 %v1624_v38  ;;  %v643_v14 = vadd.f32 %v1619_v32, %v642_v63 }
 0x17e   : > { %1242 = vrcp.f32 %v637_v39  ;;  %v1626_v41 = vadd.f32 1.0, %v1239_v40  ;;  %v1630_v43 = vpop.eup %1240  ;;  %v710_v0 = vand.u32 2147483648, %v637_v39  ;;  %v708_v5 = vand.u32 2147483647, %v637_v39  ;;  %vm1680_vm12 = vmor %vm674_vm14, %vm675_vm4 }
 0x17f   : > { %v671_v48 = vsub.f32 1.0, %v670_v42  ;;  %v685_v51 = vmul.f32 %v1630_v43, %v1617_v30  ;;  %vm704_vm8 = vweird.f32 %v637_v39  ;;  %vm690_vm11 = vweird.f32 %v1630_v43 }
 0x180   : > { %1244 = vrcp.f32 %v1626_v41  ;;  %v725_v7 = vand.u32 2147483648, %v1626_v41  ;;  %v723_v11 = vand.u32 2147483647, %v1626_v41  ;;  %v711_v13 = vor.u32 1.1754944e-38, %v710_v0  ;;  %vm1692_vm14 = vmor %vm689_vm1, %vm690_vm11 }
 0x181   : > { %v686_v57 = vsub.f32 1.0, %v685_v51  ;;  %v672_v61 = vmul.f32 %v1624_v38, %v671_v48  ;;  %vm709_vm5 = vcmp.eq.f32.partialorder %v708_v5, 8.507059e+37  ;;  %vm719_vm7 = vweird.f32 %v1626_v41  ;;  %vm661_vm1 = vmor %vm659_vm2, %vm660_vm15 }
 0x182   : > { %v726_v22 = vor.u32 1.1754944e-38, %v725_v7  ;;  %v658_v24 = vadd.f32 %v1622_v33, %v657_v1  ;;  %v647_v31 = vsel %vm1668_vm6, %v1619_v32, %v643_v14  ;;  %v696_v30 = vor.u32 1.1754944e-38, %v695_v3 }
 0x183   : > { %v687_v2 = vmul.f32 %v1630_v43, %v686_v57  ;;  %v673_v8 = vadd.f32 %v1624_v38, %v672_v61  ;;  %vm694_vm4 = vcmp.eq.f32.partialorder %v693_v36, 8.507059e+37  ;;  %v666_v42 = vor.u32 1.1754944e-38, %v665_v56  ;;  %v747_v56 = vpop.permute.xlu2 %746  ;;  %v752_v36 = vpop.permute.xlu0 %751 }
 0x184   : > { %v1243_v46 = vpop.eup %1242  ;;  %v662_v32 = vsel %vm661_vm1, %v1622_v33, %v658_v24  ;;  %vm664_vm15 = vcmp.eq.f32.partialorder %v663_v54, 8.507059e+37  ;;  %vm1911_vm2 = vcmask 162816   ;;  %v759_v48 = vunpack.c.l.b16 %v735_v47 }
 0x185   : > { %v700_v58 = vmul.f32 %v1243_v46, %v637_v39  ;;  %vm705_vm3 = vweird.f32 %v1243_v46  ;;  %v688_v15 = vadd.f32 %v1630_v43, %v687_v2  ;;  %v677_v23 = vsel %vm1680_vm12, %v1624_v38, %v673_v8  ;;  %vm1913_vm6 = vmmov %vm1911_vm2 }
 0x186   : > { %v1245_v60 = vpop.eup %1244  ;;  %vm706_vm10 = vmor %vm704_vm8, %vm705_vm3  ;;  %vm724_vm3 = vcmp.eq.f32.partialorder %v723_v11, 8.507059e+37  ;;  %vm649_vm8 = vcmp.eq.f32.partialorder %v648_v53, 8.507059e+37  ;;  %v667_v44 = vsel %vm664_vm15, %v666_v42, %v662_v32  ;;  %v761_v51 = vpack.c.b16 %v759_v48, %v759_v48 }
 0x187   : > { %v701_v50 = vsub.f32 1.0, %v700_v58  ;;  %v715_v62 = vmul.f32 %v1245_v60, %v1626_v41  ;;  %vm720_vm9 = vweird.f32 %v1245_v60  ;;  %v692_v34 = vsel %vm1692_vm14, %v1630_v43, %v688_v15 }
 0x188   : > { %vm721_vm13 = vmor %vm719_vm7, %vm720_vm9  ;;  %vm679_vm7 = vcmp.eq.f32.partialorder %v678_v59, 8.507059e+37  ;;  %v652_v41 = vsel %vm649_vm8, %v1643_v55, %v647_v31  ;;  %v697_v43 = vsel %vm694_vm4, %v696_v30, %v692_v34 }
 0x189   : > { %v702_v4 = vmul.f32 %v1243_v46, %v701_v50  ;;  %v716_v6 = vsub.f32 1.0, %v715_v62  ;;  %v682_v39 = vsel %vm679_vm7, %v681_v28, %v677_v23  ;;  %v730_v33 = vpack.c.bf16 %v697_v43, %v667_v44  ;;  %vm1912_vm9 = vmmov %vm1911_vm2 }
 0x18a   : > { %v729_v45 = vpack.c.bf16 %v682_v39, %v652_v41 }
 0x18b   : > { %v703_v9 = vadd.f32 %v1243_v46, %v702_v4  ;;  %v717_v10 = vmul.f32 %v1245_v60, %v716_v6 }
 0x18d   : > { %v707_v16 = vsel %vm706_vm10, %v1243_v46, %v703_v9  ;;  %v718_v17 = vadd.f32 %v1245_v60, %v717_v10  ;;  %vm1914_vm10 = vmmov %vm1911_vm2 }
 0x18e   : > { %v712_v21 = vsel %vm709_vm5, %v711_v13, %v707_v16 }
 0x18f   : > { %v731_v25 = vpack.c.bf16 %v712_v21, %v712_v21  ;;  %v722_v26 = vsel %vm721_vm13, %v1245_v60, %v718_v17 }
 0x190   : > { %v727_v29 = vsel %vm724_vm3, %v726_v22, %v722_v26 }
 0x191   : > { %v769_v37 = vsel %vm378_vm0, %v731_v25, 0  ;;  %v732_v38 = vpack.c.bf16 %v727_v29, %v727_v29 }
 0x192   : > { %780 = vmatpush.bf16.msrb.mxu0 %v769_v37 }
 0x193   : > { %v772_v40 = vsel %vm378_vm0, %v732_v38, 0 }
 0x194   : > { %798 = vmatpush.bf16.msrb.mxu1 %v772_v40 }
 0x196   : > { %781 = vmatpush.bf16.msrb.mxu0 %v729_v45 }
 0x198   : > { %799 = vmatpush.bf16.msrb.mxu1 %v730_v33 }
 0x199   : > { %1134 = vmatmul.msk.bf16.vlgmr.msrb.gmra.mxu0 %vm1911_vm2, %v1154_v18 }
 0x19b   : > { %1136 = vmatmul.msk.bf16.vlgmr.msrb.gmra.mxu1 %vm1912_vm9, %v1154_v18 }
 0x1a9   : > { %1135 = vmatmul.msk.bf16.gmra.mxu0 %vm1913_vm6, %v761_v51 }
 0x1ab   : > { %1137 = vmatmul.msk.bf16.gmra.mxu1 %vm1914_vm10, %v761_v51 }
 0x216   : > { %v783_v52 = vpop.f32.mrf.mxu0 }
 0x217   : > { %v784_v53 = vadd.f32 %v783_v52, %v742_v20 }
 0x218   : > { %v801_v54 = vpop.f32.mrf.mxu1 }
 0x219   : > { %v1138_v46 = vmul.f32 -1.442695, %v784_v53  ;;  %v802_v55 = vadd.f32 %v801_v54, %v742_v20 }
 0x21b   : > { %v1139_v49 = vmul.f32 -1.442695, %v802_v55  ;;  %1246 = vpow2.f32 %v1138_v46 }
 0x21d   : > { %1248 = vpow2.f32 %v1139_v49 }
 0x21e   : > { %v785_v57 = vpop.f32.mrf.mxu0 }
 0x21f   : > { %v786_v58 = vadd.f32 %v785_v57, %v747_v56 }
 0x220   : > { %v803_v59 = vpop.f32.mrf.mxu1 }
 0x221   : > { %v1140_v60 = vmul.f32 -1.442695, %v786_v58  ;;  %v804_v61 = vadd.f32 %v803_v59, %v747_v56  ;;  %v1247_v35 = vpop.eup %1246 }
 0x222   : > { %v1726_v63 = vadd.f32 1.0, %v1247_v35 }
 0x223   : > { %v1249_v50 = vpop.eup %1248  ;;  %1250 = vpow2.f32 %v1140_v60  ;;  %v1141_v62 = vmul.f32 -1.442695, %v804_v61 }
 0x224   : > { %v1728_v0 = vadd.f32 1.0, %v1249_v50  ;;  %v845_v25 = vand.u32 2147483648, %v1726_v63  ;;  %vm839_vm11 = vweird.f32 %v1726_v63  ;;  %v843_v31 = vand.u32 2147483647, %v1726_v63 }
 0x225   : > { %1252 = vpow2.f32 %v1141_v62 }
 0x226   : > { %v788_v1 = vpop.f32.mrf.mxu0  ;;  %1254 = vrcp.f32 %v1726_v63  ;;  %v858_v34 = vand.u32 2147483647, %v1728_v0  ;;  %v1761_v38 = vor.u32 1.1754944e-38, %v845_v25  ;;  %v860_v30 = vand.u32 2147483648, %v1728_v0 }
 0x227   : > { %v789_v2 = vadd.f32 %v788_v1, %v752_v36  ;;  %1256 = vrcp.f32 %v1728_v0  ;;  %vm854_vm14 = vweird.f32 %v1728_v0 }
 0x228   : > { %v806_v3 = vpop.f32.mrf.mxu1 }
 0x229   : > { %v1251_v4 = vpop.eup %1250  ;;  %v1142_v5 = vmul.f32 -1.442695, %v789_v2  ;;  %v807_v6 = vadd.f32 %v806_v3, %v752_v36 }
 0x22a   : > { %v1732_v7 = vadd.f32 1.0, %v1251_v4 }
 0x22b   : > { %v1253_v8 = vpop.eup %1252  ;;  %1258 = vpow2.f32 %v1142_v5  ;;  %v1143_v9 = vmul.f32 -1.442695, %v807_v6 }
 0x22c   : > { %1260 = vrcp.f32 %v1732_v7  ;;  %v1735_v10 = vadd.f32 1.0, %v1253_v8  ;;  %v1737_v12 = vpop.eup %1254  ;;  %vm869_vm12 = vweird.f32 %v1732_v7  ;;  %v873_v41 = vand.u32 2147483647, %v1732_v7 }
 0x22d   : > { %1262 = vpow2.f32 %v1143_v9  ;;  %v1740_v13 = vpop.eup %1256  ;;  %v835_v24 = vmul.f32 %v1737_v12, %v1726_v63  ;;  %vm840_vm5 = vweird.f32 %v1737_v12  ;;  %v875_v45 = vand.u32 2147483648, %v1732_v7 }
 0x22e   : > { %v790_v11 = vpop.f32.mrf.mxu0  ;;  %1264 = vrcp.f32 %v1735_v10  ;;  %v850_v26 = vmul.f32 %v1740_v13, %v1728_v0  ;;  %vm855_vm13 = vweird.f32 %v1740_v13  ;;  %vm884_vm3 = vweird.f32 %v1735_v10  ;;  %vm1786_vm15 = vmor %vm839_vm11, %vm840_vm5 }
 0x22f   : > { %v836_v29 = vsub.f32 1.0, %v835_v24  ;;  %v888_v47 = vand.u32 2147483647, %v1735_v10  ;;  %v890_v52 = vand.u32 2147483648, %v1735_v10  ;;  %v876_v8 = vor.u32 1.1754944e-38, %v875_v45 }
 0x230   : > { %v808_v14 = vpop.f32.mrf.mxu1  ;;  %v851_v39 = vsub.f32 1.0, %v850_v26  ;;  %v933_v26 = vpop.permute.xlu0 %932 }
 0x231   : > { %v1259_v15 = vpop.eup %1258  ;;  %v837_v33 = vmul.f32 %v1737_v12, %v836_v29 }
 0x232   : > { %v1742_v16 = vpop.eup %1260  ;;  %v832_v17 = vadd.f32 1.0, %v1259_v15  ;;  %v852_v51 = vmul.f32 %v1740_v13, %v851_v39 }
 0x233   : > { %v1263_v19 = vpop.eup %1262  ;;  %v865_v22 = vmul.f32 %v1742_v16, %v1732_v7  ;;  %vm870_vm8 = vweird.f32 %v1742_v16  ;;  %v838_v61 = vadd.f32 %v1737_v12, %v837_v33 }
 0x234   : > { %1266 = vrcp.f32 %v832_v17  ;;  %v1744_v21 = vadd.f32 1.0, %v1263_v19  ;;  %v1748_v23 = vpop.eup %1264  ;;  %v905_v48 = vand.u32 2147483648, %v832_v17  ;;  %v903_v54 = vand.u32 2147483647, %v832_v17  ;;  %vm1798_vm11 = vmor %vm869_vm12, %vm870_vm8 }
 0x235   : > { %v866_v28 = vsub.f32 1.0, %v865_v22  ;;  %v880_v27 = vmul.f32 %v1748_v23, %v1735_v10  ;;  %vm899_vm1 = vweird.f32 %v832_v17  ;;  %vm885_vm9 = vweird.f32 %v1748_v23 }
 0x236   : > { %1268 = vrcp.f32 %v1744_v21  ;;  %v920_v55 = vand.u32 2147483648, %v1744_v21  ;;  %v918_v58 = vand.u32 2147483647, %v1744_v21  ;;  %v906_v60 = vor.u32 1.1754944e-38, %v905_v48  ;;  %vm1810_vm12 = vmor %vm884_vm3, %vm885_vm9 }
 0x237   : > { %v881_v32 = vsub.f32 1.0, %v880_v27  ;;  %v867_v43 = vmul.f32 %v1742_v16, %v866_v28  ;;  %vm904_vm6 = vcmp.eq.f32.partialorder %v903_v54, 8.507059e+37  ;;  %vm914_vm10 = vweird.f32 %v1744_v21  ;;  %vm856_vm3 = vmor %vm854_vm14, %vm855_vm13 }
 0x238   : > { %v921_v2 = vor.u32 1.1754944e-38, %v920_v55  ;;  %v853_v4 = vadd.f32 %v1740_v13, %v852_v51  ;;  %v842_v11 = vsel %vm1786_vm15, %v1737_v12, %v838_v61  ;;  %v891_v10 = vor.u32 1.1754944e-38, %v890_v52 }
 0x239   : > { %v882_v20 = vmul.f32 %v1748_v23, %v881_v32  ;;  %v868_v49 = vadd.f32 %v1742_v16, %v867_v43  ;;  %vm844_vm8 = vcmp.eq.f32.partialorder %v843_v31, 8.507059e+37  ;;  %v861_v22 = vor.u32 1.1754944e-38, %v860_v30 }
 0x23a   : > { %v1267_v37 = vpop.eup %1266  ;;  %v857_v12 = vsel %vm856_vm3, %v1740_v13, %v853_v4  ;;  %vm859_vm13 = vcmp.eq.f32.partialorder %v858_v34, 8.507059e+37  ;;  %v928_v13 = vld [vmem:[%s1891_s7] sm:$0x1]  ;;  %v935_v28 = vperm.slane %v933_v26, 0 }
 0x23b   : > { %v895_v40 = vmul.f32 %v1267_v37, %v832_v17  ;;  %vm900_vm7 = vweird.f32 %v1267_v37  ;;  %v883_v35 = vadd.f32 %v1748_v23, %v882_v20  ;;  %v872_v3 = vsel %vm1798_vm11, %v1742_v16, %v868_v49 }
 0x23c   : > { %v1269_v42 = vpop.eup %1268  ;;  %vm901_vm2 = vmor %vm899_vm1, %vm900_vm7  ;;  %vm919_vm7 = vcmp.eq.f32.partialorder %v918_v58, 8.507059e+37  ;;  %vm874_vm1 = vcmp.eq.f32.partialorder %v873_v41, 8.507059e+37  ;;  %v862_v25 = vsel %vm859_vm13, %v861_v22, %v857_v12  ;;  %v1015_v49 = vlaneseq }
 0x23d   : > { %v896_v44 = vsub.f32 1.0, %v895_v40  ;;  %v910_v18 = vmul.f32 %v1269_v42, %v1744_v21  ;;  %vm915_vm4 = vweird.f32 %v1269_v42  ;;  %v887_v14 = vsel %vm1810_vm12, %v1748_v23, %v883_v35 }
 0x23e   : > { %vm916_vm5 = vmor %vm914_vm10, %vm915_vm4  ;;  %v877_v17 = vsel %vm874_vm1, %v876_v8, %v872_v3  ;;  %vm889_vm4 = vcmp.eq.f32.partialorder %v888_v47, 8.507059e+37  ;;  %v847_v21 = vsel %vm844_vm8, %v1761_v38, %v842_v11  ;;  %vm1017_vm1 = vcmp.lt.s32.totalorder %v1015_v49, 256 }
 0x23f   : > { %v897_v53 = vmul.f32 %v1267_v37, %v896_v44  ;;  %v911_v46 = vsub.f32 1.0, %v910_v18  ;;  %v892_v23 = vsel %vm889_vm4, %v891_v10, %v887_v14  ;;  %v924_v24 = vpack.c.bf16 %v877_v17, %v847_v21 }
 0x240   : > { %v925_v63 = vpack.c.bf16 %v892_v23, %v862_v25 }
 0x241   : > { %v898_v56 = vadd.f32 %v1267_v37, %v897_v53  ;;  %v912_v57 = vmul.f32 %v1269_v42, %v911_v46 }
 0x243   : > { %v902_v50 = vsel %vm901_vm2, %v1267_v37, %v898_v56  ;;  %v913_v62 = vadd.f32 %v1269_v42, %v912_v57 }
 0x244   : > { %v907_v1 = vsel %vm904_vm6, %v906_v60, %v902_v50 }
 0x245   : > { %v926_v5 = vpack.c.bf16 %v907_v1, %v907_v1  ;;  %v917_v6 = vsel %vm916_vm5, %v1269_v42, %v913_v62 }
 0x246   : > { %v922_v9 = vsel %vm919_vm7, %v921_v2, %v917_v6  ;;  %vm1012_vm7 = vcmask 1040384  }
 0x247   : > { %v940_v15 = vsel %vm378_vm0, %v926_v5, 0  ;;  %v927_v16 = vpack.c.bf16 %v922_v9, %v922_v9 }
 0x248   : > { %951 = vmatpush.bf16.msrb.mxu2 %v940_v15 }
 0x249   : > { %v943_v19 = vsel %vm378_vm0, %v927_v16, 0  ;;  %vm1921_vm0 = vcmask 162816  }
 0x24a   : > { %964 = vmatpush.bf16.msrb.mxu3 %v943_v19  ;;  %vm1922_vm14 = vmmov %vm1921_vm0 }
 0x24c   : > { %952 = vmatpush.bf16.msrb.mxu2 %v924_v24 }
 0x24e   : > { %965 = vmatpush.bf16.msrb.mxu3 %v925_v63 }
 0x24f   : > { %1144 = vmatmul.msk.bf16.vlgmr.msrb.gmra.mxu2 %vm1921_vm0, %v928_v13 }
 0x251   : > { %1145 = vmatmul.msk.bf16.vlgmr.msrb.gmra.mxu3 %vm1922_vm14, %v928_v13 }
 0x2d2   : > { %v954_v27 = vpop.f32.mrf.mxu2 }
 0x2d3   : > { %v955_v29 = vadd.f32 %v954_v27, %v935_v28 }
 0x2d4   : > { %v967_v31 = vpop.f32.mrf.mxu3 }
 0x2d5   : > { %v1146_v37 = vmul.f32 -1.442695, %v955_v29  ;;  %v968_v0 = vadd.f32 %v967_v31, %v935_v28 }
 0x2d7   : > { %1270 = vpow2.f32 %v1146_v37  ;;  %v1147_v34 = vmul.f32 -1.442695, %v968_v0 }
 0x2d9   : > { %1272 = vpow2.f32 %v1147_v34 }
 0x2da   : > { %v956_v38 = vpop.f32.mrf.mxu2 }
 0x2dc   : > { %v969_v39 = vpop.f32.mrf.mxu3 }
 0x2dd   : > { %v1271_v30 = vpop.eup %1270 }
 0x2de   : > { %v977_v32 = vadd.f32 1.0, %v1271_v30 }
 0x2df   : > { %v1273_v40 = vpop.eup %1272 }
 0x2e0   : > { %1274 = vrcp.f32 %v977_v32  ;;  %v978_v41 = vadd.f32 1.0, %v1273_v40  ;;  %vm984_vm9 = vweird.f32 %v977_v32  ;;  %v990_v53 = vand.u32 2147483648, %v977_v32 }
 0x2e1   : > { %v988_v46 = vand.u32 2147483647, %v977_v32 }
 0x2e2   : > { %1276 = vrcp.f32 %v978_v41  ;;  %v1005_v48 = vand.u32 2147483648, %v978_v41  ;;  %v1003_v52 = vand.u32 2147483647, %v978_v41  ;;  %vm999_vm6 = vweird.f32 %v978_v41 }
 0x2e3   : > { %v991_v59 = vor.u32 1.1754944e-38, %v990_v53  ;;  %vm989_vm12 = vcmp.eq.f32.partialorder %v988_v46, 8.507059e+37 }
 0x2e4   : > { %v1006_v56 = vor.u32 1.1754944e-38, %v1005_v48  ;;  %vm1004_vm5 = vcmp.eq.f32.partialorder %v1003_v52, 8.507059e+37 }
 0x2e6   : > { %v1275_v42 = vpop.eup %1274 }
 0x2e7   : > { %v980_v43 = vmul.f32 %v1275_v42, %v977_v32  ;;  %vm985_vm15 = vweird.f32 %v1275_v42 }
 0x2e8   : > { %v1277_v45 = vpop.eup %1276  ;;  %vm1848_vm10 = vmor %vm984_vm9, %vm985_vm15 }
 0x2e9   : > { %v981_v44 = vsub.f32 1.0, %v980_v43  ;;  %v995_v18 = vmul.f32 %v1277_v45, %v978_v41  ;;  %vm1000_vm2 = vweird.f32 %v1277_v45 }
 0x2ea   : > { %vm1001_vm11 = vmor %vm999_vm6, %vm1000_vm2 }
 0x2eb   : > { %v996_v33 = vsub.f32 1.0, %v995_v18  ;;  %v982_v47 = vmul.f32 %v1275_v42, %v981_v44 }
 0x2ed   : > { %v997_v51 = vmul.f32 %v1277_v45, %v996_v33  ;;  %v983_v20 = vadd.f32 %v1275_v42, %v982_v47 }
 0x2ef   : > { %v998_v55 = vadd.f32 %v1277_v45, %v997_v51  ;;  %v987_v57 = vsel %vm1848_vm10, %v1275_v42, %v983_v20 }
 0x2f0   : > { %v992_v35 = vsel %vm989_vm12, %v991_v59, %v987_v57 }
 0x2f1   : > { %v1002_v58 = vsel %vm1001_vm11, %v1277_v45, %v998_v55 }
 0x2f2   : > { %v1007_v60 = vsel %vm1004_vm5, %v1006_v56, %v1002_v58 }
 0x2f3   : > { %v1011_v61 = vrot.slane %v1007_v60, 7 }
 0x2f5   : > { %v1013_v50 = vsel %vm1012_vm7, %v992_v35, %v1011_v61 }
 0x2f6   : > { %1019 = vst.msk [vmem:[%s328_s26] sm:$0x3] %vm1017_vm1, %v1013_v50 }
 0x2f7   : > { %1305 = shalt.err (!%p1302_p3)
}
 0x2f8   : > { %1155 = dma.vmem_to_hbm [thread:$0]  (%p1431_p5), %s1034_s27, 32, %s1036_s28, %s1021_s22  }
 0x2f9 PF: > { %p1161_p4 = scmp.ge.s32.totalorder %s1340_s14, 2  ;;  %s1047_s17 = sand.u32 1, %s1328_s11  }
 0x2fa   : > { %s1048_s24 = scalar_lea.sflag [#allocation4], %s1047_s17 }
 0x2fb   : > { %p1158_p7 = pnand %p1161_p4, %p1435_p6 }
 0x2fd   : > { %p1159_p8 = pneg %p1158_p7 }
 0x2ff   : > { %1323 = dma.done.wait (%p1159_p8), %s1048_s24, 32  }
 0x300   : > { %1325 = vsyncadd (%p1159_p8), %s1048_s24, 4294967264  ;;  %p21_p9 = scmp.ge.s32.totalorder %s1419_s16, 4   ;;  %s1925_s11 = smov %s1332_s12 }
 0x301   : > { %s1926_s12 = smov %s1336_s13  ;;  %s1927_s13 = smov %s1429_s19 }
 0x302   : > { %s1928_s14 = smov %s1419_s16  ;;  %23 = sbr.rel (!%p21_p9) target bundleno = 6 (0x6), region = 91 }
 0x307   :  { %1054 = vsyncpa [#allocation4], 1 }
 0x308   :  { %1056 = vsyncpa [#allocation4 + $0x1], 1 }

</bundles_post_ra>
